<compile_context>
chip_gen: v6e
topology: v6e:2x2x1
jax: 0.10.0
libtpu: 0.0.40
codegen_flags: <defaults>
</compile_context>

<pallas_src>
import jax
import jax.numpy as jnp
from jax.experimental import pallas as pl


def lstm_last_linear_kernel(x_ref, wih_ref, whh_ref, b_ref, wlin_ref, blin_ref,
                            out_ref):
    """Single-invocation LSTM recurrence + last-step Linear.

    x_ref    : (B, T, D_in)  bf16  input sequence (batch_first, no transpose)
    wih_ref  : (D_in, 4H)    bf16  packed input weights, gate lanes i|f|g|o
    whh_ref  : (H, 4H)       bf16  packed recurrent weights
    b_ref    : (1, 4H)       f32   b_ih + b_hh
    wlin_ref : (H, D_out)    f32
    blin_ref : (1, D_out)    f32
    out_ref  : (B, D_out)    f32
    """
    B, T, D_in = x_ref.shape
    H = whh_ref.shape[0]
    H4 = whh_ref.shape[1]

    w_ih = wih_ref[...]                    # (D_in, 4H) bf16
    w_hh = whh_ref[...]                    # (H, 4H)    bf16
    bias = b_ref[...]                      # (1, 4H)    f32

    # ---- Hoisted input projection: one batched matmul for all timesteps ----
    # (B*T, D_in) @ (D_in, 4H) -> (B*T, 4H), f32 accumulation; off the serial
    # critical path.
    x2d = x_ref[...].reshape(B * T, D_in)
    gx_all = (jnp.dot(x2d, w_ih, preferred_element_type=jnp.float32)
              + bias).reshape(B, T, H4)    # (B, T, 4H) f32

    # Lane mask selecting the g-gate segment (lanes [2H, 3H)) -> tanh; the
    # other three segments get sigmoid.
    lane = jax.lax.broadcasted_iota(jnp.int32, (B, H4), 1)
    g_lanes = jnp.logical_and(lane >= 2 * H, lane < 3 * H)

    # ---- Recurrence: one packed MXU pass + two EUP pushes per step ----------
    h = jnp.zeros((B, H), jnp.float32)
    c = jnp.zeros((B, H), jnp.float32)
    for t in range(T):                     # T is small & static: full unroll
        gates = gx_all[:, t, :] + jnp.dot(h.astype(jnp.bfloat16), w_hh,
                                          preferred_element_type=jnp.float32)
        act = jnp.where(g_lanes, jnp.tanh(gates), jax.nn.sigmoid(gates))
        i_g = act[:, 0 * H:1 * H]
        f_g = act[:, 1 * H:2 * H]
        g_g = act[:, 2 * H:3 * H]
        o_g = act[:, 3 * H:4 * H]
        c = f_g * c + i_g * g_g
        h = o_g * jnp.tanh(c)

    # ---- Final Linear on h_T (single dot, off critical path, kept f32) ------
    y = jnp.dot(h, wlin_ref[...], preferred_element_type=jnp.float32) + blin_ref[...]
    out_ref[...] = y.astype(out_ref.dtype)


def lstm_model_forward(x, params):
    """x: (B, T, D_in) float32 -> (B, D_out) float32."""
    B, T, D_in = x.shape
    w_ih = params["w_ih"]      # (4H, D_in)  PyTorch packing, gate order i,f,g,o
    w_hh = params["w_hh"]      # (4H, H)
    H = w_hh.shape[1]
    D_out = params["w_lin"].shape[0]

    # Lane-dense packed weights (cheap, weight-sized XLA ops, done once).
    wih_p = jnp.transpose(w_ih).astype(jnp.bfloat16)              # (D_in, 4H)
    whh_p = jnp.transpose(w_hh).astype(jnp.bfloat16)              # (H, 4H)
    bias = (params["b_ih"] + params["b_hh"]).reshape(1, 4 * H)    # (1, 4H) f32
    wlin_t = jnp.transpose(params["w_lin"])                       # (H, D_out) f32
    blin = params["b_lin"].reshape(1, D_out)                      # (1, D_out) f32

    x_bf = x.astype(jnp.bfloat16)

    # No grid / no BlockSpecs: whole problem is resident in VMEM for one
    # invocation (removes the degenerate one-step grid loop entirely).
    return pl.pallas_call(
        lstm_last_linear_kernel,
        out_shape=jax.ShapeDtypeStruct((B, D_out), jnp.float32),
    )(x_bf, wih_p, whh_p, bias, wlin_t, blin)


def lstm_model_reference(x, params):
    """Pure-JAX f32 reference matching PyTorch nn.LSTM + nn.Linear semantics."""
    B, T, D_in = x.shape
    H = params["w_hh"].shape[1]
    w_ih, w_hh = params["w_ih"], params["w_hh"]
    b = params["b_ih"] + params["b_hh"]

    def step(carry, x_t):
        h, c = carry
        gates = x_t @ w_ih.T + h @ w_hh.T + b
        i = jax.nn.sigmoid(gates[:, 0 * H:1 * H])
        f = jax.nn.sigmoid(gates[:, 1 * H:2 * H])
        g = jnp.tanh(gates[:, 2 * H:3 * H])
        o = jax.nn.sigmoid(gates[:, 3 * H:4 * H])
        c = f * c + i * g
        h = o * jnp.tanh(c)
        return (h, c), None

    h0 = jnp.zeros((B, H), jnp.float32)
    c0 = jnp.zeros((B, H), jnp.float32)
    (h_last, _), _ = jax.lax.scan(step, (h0, c0), jnp.transpose(x, (1, 0, 2)))
    return h_last @ params["w_lin"].T + params["b_lin"]


def init_params(key, input_dim, hidden_dim, output_dim):
    """Deterministic init mirroring PyTorch default U(-1/sqrt(H), 1/sqrt(H))."""
    ks = jax.random.split(key, 6)
    bound = 1.0 / jnp.sqrt(jnp.float32(hidden_dim))
    u = lambda k, shape: jax.random.uniform(k, shape, jnp.float32, -bound, bound)
    return {
        "w_ih": u(ks[0], (4 * hidden_dim, input_dim)),
        "w_hh": u(ks[1], (4 * hidden_dim, hidden_dim)),
        "b_ih": u(ks[2], (4 * hidden_dim,)),
        "b_hh": u(ks[3], (4 * hidden_dim,)),
        "w_lin": u(ks[4], (output_dim, hidden_dim)),
        "b_lin": u(ks[5], (output_dim,)),
    }


if __name__ == "__main__":
    B, T, D_IN, H, D_OUT = 2, 8, 16, 32, 8   # 4H = 128 -> exactly one lane-dense vreg

    key = jax.random.PRNGKey(0)
    k_x, k_p = jax.random.split(key)
    x = jax.random.normal(k_x, (B, T, D_IN), jnp.float32)
    params = init_params(k_p, D_IN, H, D_OUT)

    out = jax.block_until_ready(lstm_model_forward(x, params))
    ref = jax.block_until_ready(lstm_model_reference(x, params))

    assert out.shape == (B, D_OUT)
    # bf16 matmul operands (f32 accumulation / f32 state) vs. the pure-f32
    # reference -> slightly loosened tolerance, per review.
    max_err = float(jnp.max(jnp.abs(out - ref)))
    assert jnp.allclose(out, ref, atol=5e-2, rtol=5e-2), (
        f"mismatch vs reference, max abs err = {max_err}")
    print("KERNEL_OK")
</pallas_src>

<mosaic_0001>
module attributes {stable_mosaic.version = 11 : i64} {
  func.func @lstm_last_linear_kernel(%arg0: memref<2x8x16xbf16, #tpu.memory_space<vmem>>, %arg1: memref<16x128xbf16, #tpu.memory_space<vmem>>, %arg2: memref<32x128xbf16, #tpu.memory_space<vmem>>, %arg3: memref<1x128xf32, #tpu.memory_space<vmem>>, %arg4: memref<32x8xf32, #tpu.memory_space<vmem>>, %arg5: memref<1x8xf32, #tpu.memory_space<vmem>>, %arg6: memref<2x8xf32, #tpu.memory_space<vmem>>) attributes {dimension_semantics = [], scalar_prefetch = 0 : i64, scratch_operands = 0 : i64, tpu.core_type = #tpu.core_type<tc>} {
    %c0 = arith.constant 0 : index
    %c0_0 = arith.constant 0 : index
    %0 = vector.load %arg1[%c0, %c0_0] : memref<16x128xbf16, #tpu.memory_space<vmem>>, vector<16x128xbf16>
    %c0_1 = arith.constant 0 : index
    %c0_2 = arith.constant 0 : index
    %1 = vector.load %arg2[%c0_1, %c0_2] : memref<32x128xbf16, #tpu.memory_space<vmem>>, vector<32x128xbf16>
    %c0_3 = arith.constant 0 : index
    %c0_4 = arith.constant 0 : index
    %2 = vector.load %arg3[%c0_3, %c0_4] : memref<1x128xf32, #tpu.memory_space<vmem>>, vector<1x128xf32>
    %c0_5 = arith.constant 0 : index
    %c0_6 = arith.constant 0 : index
    %c0_7 = arith.constant 0 : index
    %3 = vector.load %arg0[%c0_5, %c0_6, %c0_7] : memref<2x8x16xbf16, #tpu.memory_space<vmem>>, vector<2x8x16xbf16>
    %4 = vector.shape_cast %3 : vector<2x8x16xbf16> to vector<16x16xbf16>
    %cst = arith.constant dense<0.000000e+00> : vector<16x128xf32>
    %5 = tpu.matmul %4, %0, %cst {dimension_numbers = #tpu.dot_dimension_numbers<[1], [0], [0], [1], [0, 0, 1, 1], [], []>} : vector<16x16xbf16>, vector<16x128xbf16>, vector<16x128xf32> -> vector<16x128xf32>
    %6 = vector.broadcast %2 : vector<1x128xf32> to vector<16x128xf32>
    %7 = arith.addf %5, %6 : vector<16x128xf32>
    %8 = vector.shape_cast %7 : vector<16x128xf32> to vector<2x8x128xf32>
    %9 = tpu.iota {dimensions = array<i32: 1>} : vector<2x128xi32>
    %c64_i32 = arith.constant 64 : i32
    %10 = vector.broadcast %c64_i32 : i32 to vector<2x128xi32>
    %11 = arith.cmpi sge, %9, %10 : vector<2x128xi32>
    %c96_i32 = arith.constant 96 : i32
    %12 = vector.broadcast %c96_i32 : i32 to vector<2x128xi32>
    %13 = arith.cmpi slt, %9, %12 : vector<2x128xi32>
    %14 = arith.andi %11, %13 : vector<2x128xi1>
    %cst_8 = arith.constant 0.000000e+00 : f32
    %15 = vector.broadcast %cst_8 : f32 to vector<2x32xf32>
    %cst_9 = arith.constant 0.000000e+00 : f32
    %16 = vector.broadcast %cst_9 : f32 to vector<2x32xf32>
    %17 = vector.extract_strided_slice %8 {offsets = [0, 0, 0], sizes = [2, 1, 128], strides = [1, 1, 1]} : vector<2x8x128xf32> to vector<2x1x128xf32>
    %18 = vector.shape_cast %17 : vector<2x1x128xf32> to vector<2x128xf32>
    %19 = arith.truncf %15 : vector<2x32xf32> to vector<2x32xbf16>
    %cst_10 = arith.constant dense<0.000000e+00> : vector<2x128xf32>
    %20 = tpu.matmul %19, %1, %cst_10 {dimension_numbers = #tpu.dot_dimension_numbers<[1], [0], [0], [1], [0, 0, 1, 1], [], []>} : vector<2x32xbf16>, vector<32x128xbf16>, vector<2x128xf32> -> vector<2x128xf32>
    %21 = arith.addf %18, %20 : vector<2x128xf32>
    %22 = math.tanh %21 : vector<2x128xf32>
    %23 = arith.negf %21 : vector<2x128xf32>
    %24 = math.exp %23 : vector<2x128xf32>
    %cst_11 = arith.constant 1.000000e+00 : f32
    %25 = vector.broadcast %cst_11 : f32 to vector<2x128xf32>
    %26 = arith.addf %25, %24 : vector<2x128xf32>
    %27 = arith.divf %25, %26 : vector<2x128xf32>
    %28 = arith.select %14, %22, %27 : vector<2x128xi1>, vector<2x128xf32>
    %29 = vector.extract_strided_slice %28 {offsets = [0, 0], sizes = [2, 32], strides = [1, 1]} : vector<2x128xf32> to vector<2x32xf32>
    %30 = vector.extract_strided_slice %28 {offsets = [0, 32], sizes = [2, 32], strides = [1, 1]} : vector<2x128xf32> to vector<2x32xf32>
    %31 = vector.extract_strided_slice %28 {offsets = [0, 64], sizes = [2, 32], strides = [1, 1]} : vector<2x128xf32> to vector<2x32xf32>
    %32 = vector.extract_strided_slice %28 {offsets = [0, 96], sizes = [2, 32], strides = [1, 1]} : vector<2x128xf32> to vector<2x32xf32>
    %33 = arith.mulf %30, %16 : vector<2x32xf32>
    %34 = arith.mulf %29, %31 : vector<2x32xf32>
    %35 = arith.addf %33, %34 : vector<2x32xf32>
    %36 = math.tanh %35 : vector<2x32xf32>
    %37 = arith.mulf %32, %36 : vector<2x32xf32>
    %38 = vector.extract_strided_slice %8 {offsets = [0, 1, 0], sizes = [2, 1, 128], strides = [1, 1, 1]} : vector<2x8x128xf32> to vector<2x1x128xf32>
    %39 = vector.shape_cast %38 : vector<2x1x128xf32> to vector<2x128xf32>
    %40 = arith.truncf %37 : vector<2x32xf32> to vector<2x32xbf16>
    %cst_12 = arith.constant dense<0.000000e+00> : vector<2x128xf32>
    %41 = tpu.matmul %40, %1, %cst_12 {dimension_numbers = #tpu.dot_dimension_numbers<[1], [0], [0], [1], [0, 0, 1, 1], [], []>} : vector<2x32xbf16>, vector<32x128xbf16>, vector<2x128xf32> -> vector<2x128xf32>
    %42 = arith.addf %39, %41 : vector<2x128xf32>
    %43 = math.tanh %42 : vector<2x128xf32>
    %44 = arith.negf %42 : vector<2x128xf32>
    %45 = math.exp %44 : vector<2x128xf32>
    %cst_13 = arith.constant 1.000000e+00 : f32
    %46 = vector.broadcast %cst_13 : f32 to vector<2x128xf32>
    %47 = arith.addf %46, %45 : vector<2x128xf32>
    %48 = arith.divf %46, %47 : vector<2x128xf32>
    %49 = arith.select %14, %43, %48 : vector<2x128xi1>, vector<2x128xf32>
    %50 = vector.extract_strided_slice %49 {offsets = [0, 0], sizes = [2, 32], strides = [1, 1]} : vector<2x128xf32> to vector<2x32xf32>
    %51 = vector.extract_strided_slice %49 {offsets = [0, 32], sizes = [2, 32], strides = [1, 1]} : vector<2x128xf32> to vector<2x32xf32>
    %52 = vector.extract_strided_slice %49 {offsets = [0, 64], sizes = [2, 32], strides = [1, 1]} : vector<2x128xf32> to vector<2x32xf32>
    %53 = vector.extract_strided_slice %49 {offsets = [0, 96], sizes = [2, 32], strides = [1, 1]} : vector<2x128xf32> to vector<2x32xf32>
    %54 = arith.mulf %51, %35 : vector<2x32xf32>
    %55 = arith.mulf %50, %52 : vector<2x32xf32>
    %56 = arith.addf %54, %55 : vector<2x32xf32>
    %57 = math.tanh %56 : vector<2x32xf32>
    %58 = arith.mulf %53, %57 : vector<2x32xf32>
    %59 = vector.extract_strided_slice %8 {offsets = [0, 2, 0], sizes = [2, 1, 128], strides = [1, 1, 1]} : vector<2x8x128xf32> to vector<2x1x128xf32>
    %60 = vector.shape_cast %59 : vector<2x1x128xf32> to vector<2x128xf32>
    %61 = arith.truncf %58 : vector<2x32xf32> to vector<2x32xbf16>
    %cst_14 = arith.constant dense<0.000000e+00> : vector<2x128xf32>
    %62 = tpu.matmul %61, %1, %cst_14 {dimension_numbers = #tpu.dot_dimension_numbers<[1], [0], [0], [1], [0, 0, 1, 1], [], []>} : vector<2x32xbf16>, vector<32x128xbf16>, vector<2x128xf32> -> vector<2x128xf32>
    %63 = arith.addf %60, %62 : vector<2x128xf32>
    %64 = math.tanh %63 : vector<2x128xf32>
    %65 = arith.negf %63 : vector<2x128xf32>
    %66 = math.exp %65 : vector<2x128xf32>
    %cst_15 = arith.constant 1.000000e+00 : f32
    %67 = vector.broadcast %cst_15 : f32 to vector<2x128xf32>
    %68 = arith.addf %67, %66 : vector<2x128xf32>
    %69 = arith.divf %67, %68 : vector<2x128xf32>
    %70 = arith.select %14, %64, %69 : vector<2x128xi1>, vector<2x128xf32>
    %71 = vector.extract_strided_slice %70 {offsets = [0, 0], sizes = [2, 32], strides = [1, 1]} : vector<2x128xf32> to vector<2x32xf32>
    %72 = vector.extract_strided_slice %70 {offsets = [0, 32], sizes = [2, 32], strides = [1, 1]} : vector<2x128xf32> to vector<2x32xf32>
    %73 = vector.extract_strided_slice %70 {offsets = [0, 64], sizes = [2, 32], strides = [1, 1]} : vector<2x128xf32> to vector<2x32xf32>
    %74 = vector.extract_strided_slice %70 {offsets = [0, 96], sizes = [2, 32], strides = [1, 1]} : vector<2x128xf32> to vector<2x32xf32>
    %75 = arith.mulf %72, %56 : vector<2x32xf32>
    %76 = arith.mulf %71, %73 : vector<2x32xf32>
    %77 = arith.addf %75, %76 : vector<2x32xf32>
    %78 = math.tanh %77 : vector<2x32xf32>
    %79 = arith.mulf %74, %78 : vector<2x32xf32>
    %80 = vector.extract_strided_slice %8 {offsets = [0, 3, 0], sizes = [2, 1, 128], strides = [1, 1, 1]} : vector<2x8x128xf32> to vector<2x1x128xf32>
    %81 = vector.shape_cast %80 : vector<2x1x128xf32> to vector<2x128xf32>
    %82 = arith.truncf %79 : vector<2x32xf32> to vector<2x32xbf16>
    %cst_16 = arith.constant dense<0.000000e+00> : vector<2x128xf32>
    %83 = tpu.matmul %82, %1, %cst_16 {dimension_numbers = #tpu.dot_dimension_numbers<[1], [0], [0], [1], [0, 0, 1, 1], [], []>} : vector<2x32xbf16>, vector<32x128xbf16>, vector<2x128xf32> -> vector<2x128xf32>
    %84 = arith.addf %81, %83 : vector<2x128xf32>
    %85 = math.tanh %84 : vector<2x128xf32>
    %86 = arith.negf %84 : vector<2x128xf32>
    %87 = math.exp %86 : vector<2x128xf32>
    %cst_17 = arith.constant 1.000000e+00 : f32
    %88 = vector.broadcast %cst_17 : f32 to vector<2x128xf32>
    %89 = arith.addf %88, %87 : vector<2x128xf32>
    %90 = arith.divf %88, %89 : vector<2x128xf32>
    %91 = arith.select %14, %85, %90 : vector<2x128xi1>, vector<2x128xf32>
    %92 = vector.extract_strided_slice %91 {offsets = [0, 0], sizes = [2, 32], strides = [1, 1]} : vector<2x128xf32> to vector<2x32xf32>
    %93 = vector.extract_strided_slice %91 {offsets = [0, 32], sizes = [2, 32], strides = [1, 1]} : vector<2x128xf32> to vector<2x32xf32>
    %94 = vector.extract_strided_slice %91 {offsets = [0, 64], sizes = [2, 32], strides = [1, 1]} : vector<2x128xf32> to vector<2x32xf32>
    %95 = vector.extract_strided_slice %91 {offsets = [0, 96], sizes = [2, 32], strides = [1, 1]} : vector<2x128xf32> to vector<2x32xf32>
    %96 = arith.mulf %93, %77 : vector<2x32xf32>
    %97 = arith.mulf %92, %94 : vector<2x32xf32>
    %98 = arith.addf %96, %97 : vector<2x32xf32>
    %99 = math.tanh %98 : vector<2x32xf32>
    %100 = arith.mulf %95, %99 : vector<2x32xf32>
    %101 = vector.extract_strided_slice %8 {offsets = [0, 4, 0], sizes = [2, 1, 128], strides = [1, 1, 1]} : vector<2x8x128xf32> to vector<2x1x128xf32>
    %102 = vector.shape_cast %101 : vector<2x1x128xf32> to vector<2x128xf32>
    %103 = arith.truncf %100 : vector<2x32xf32> to vector<2x32xbf16>
    %cst_18 = arith.constant dense<0.000000e+00> : vector<2x128xf32>
    %104 = tpu.matmul %103, %1, %cst_18 {dimension_numbers = #tpu.dot_dimension_numbers<[1], [0], [0], [1], [0, 0, 1, 1], [], []>} : vector<2x32xbf16>, vector<32x128xbf16>, vector<2x128xf32> -> vector<2x128xf32>
    %105 = arith.addf %102, %104 : vector<2x128xf32>
    %106 = math.tanh %105 : vector<2x128xf32>
    %107 = arith.negf %105 : vector<2x128xf32>
    %108 = math.exp %107 : vector<2x128xf32>
    %cst_19 = arith.constant 1.000000e+00 : f32
    %109 = vector.broadcast %cst_19 : f32 to vector<2x128xf32>
    %110 = arith.addf %109, %108 : vector<2x128xf32>
    %111 = arith.divf %109, %110 : vector<2x128xf32>
    %112 = arith.select %14, %106, %111 : vector<2x128xi1>, vector<2x128xf32>
    %113 = vector.extract_strided_slice %112 {offsets = [0, 0], sizes = [2, 32], strides = [1, 1]} : vector<2x128xf32> to vector<2x32xf32>
    %114 = vector.extract_strided_slice %112 {offsets = [0, 32], sizes = [2, 32], strides = [1, 1]} : vector<2x128xf32> to vector<2x32xf32>
    %115 = vector.extract_strided_slice %112 {offsets = [0, 64], sizes = [2, 32], strides = [1, 1]} : vector<2x128xf32> to vector<2x32xf32>
    %116 = vector.extract_strided_slice %112 {offsets = [0, 96], sizes = [2, 32], strides = [1, 1]} : vector<2x128xf32> to vector<2x32xf32>
    %117 = arith.mulf %114, %98 : vector<2x32xf32>
    %118 = arith.mulf %113, %115 : vector<2x32xf32>
    %119 = arith.addf %117, %118 : vector<2x32xf32>
    %120 = math.tanh %119 : vector<2x32xf32>
    %121 = arith.mulf %116, %120 : vector<2x32xf32>
    %122 = vector.extract_strided_slice %8 {offsets = [0, 5, 0], sizes = [2, 1, 128], strides = [1, 1, 1]} : vector<2x8x128xf32> to vector<2x1x128xf32>
    %123 = vector.shape_cast %122 : vector<2x1x128xf32> to vector<2x128xf32>
    %124 = arith.truncf %121 : vector<2x32xf32> to vector<2x32xbf16>
    %cst_20 = arith.constant dense<0.000000e+00> : vector<2x128xf32>
    %125 = tpu.matmul %124, %1, %cst_20 {dimension_numbers = #tpu.dot_dimension_numbers<[1], [0], [0], [1], [0, 0, 1, 1], [], []>} : vector<2x32xbf16>, vector<32x128xbf16>, vector<2x128xf32> -> vector<2x128xf32>
    %126 = arith.addf %123, %125 : vector<2x128xf32>
    %127 = math.tanh %126 : vector<2x128xf32>
    %128 = arith.negf %126 : vector<2x128xf32>
    %129 = math.exp %128 : vector<2x128xf32>
    %cst_21 = arith.constant 1.000000e+00 : f32
    %130 = vector.broadcast %cst_21 : f32 to vector<2x128xf32>
    %131 = arith.addf %130, %129 : vector<2x128xf32>
    %132 = arith.divf %130, %131 : vector<2x128xf32>
    %133 = arith.select %14, %127, %132 : vector<2x128xi1>, vector<2x128xf32>
    %134 = vector.extract_strided_slice %133 {offsets = [0, 0], sizes = [2, 32], strides = [1, 1]} : vector<2x128xf32> to vector<2x32xf32>
    %135 = vector.extract_strided_slice %133 {offsets = [0, 32], sizes = [2, 32], strides = [1, 1]} : vector<2x128xf32> to vector<2x32xf32>
    %136 = vector.extract_strided_slice %133 {offsets = [0, 64], sizes = [2, 32], strides = [1, 1]} : vector<2x128xf32> to vector<2x32xf32>
    %137 = vector.extract_strided_slice %133 {offsets = [0, 96], sizes = [2, 32], strides = [1, 1]} : vector<2x128xf32> to vector<2x32xf32>
    %138 = arith.mulf %135, %119 : vector<2x32xf32>
    %139 = arith.mulf %134, %136 : vector<2x32xf32>
    %140 = arith.addf %138, %139 : vector<2x32xf32>
    %141 = math.tanh %140 : vector<2x32xf32>
    %142 = arith.mulf %137, %141 : vector<2x32xf32>
    %143 = vector.extract_strided_slice %8 {offsets = [0, 6, 0], sizes = [2, 1, 128], strides = [1, 1, 1]} : vector<2x8x128xf32> to vector<2x1x128xf32>
    %144 = vector.shape_cast %143 : vector<2x1x128xf32> to vector<2x128xf32>
    %145 = arith.truncf %142 : vector<2x32xf32> to vector<2x32xbf16>
    %cst_22 = arith.constant dense<0.000000e+00> : vector<2x128xf32>
    %146 = tpu.matmul %145, %1, %cst_22 {dimension_numbers = #tpu.dot_dimension_numbers<[1], [0], [0], [1], [0, 0, 1, 1], [], []>} : vector<2x32xbf16>, vector<32x128xbf16>, vector<2x128xf32> -> vector<2x128xf32>
    %147 = arith.addf %144, %146 : vector<2x128xf32>
    %148 = math.tanh %147 : vector<2x128xf32>
    %149 = arith.negf %147 : vector<2x128xf32>
    %150 = math.exp %149 : vector<2x128xf32>
    %cst_23 = arith.constant 1.000000e+00 : f32
    %151 = vector.broadcast %cst_23 : f32 to vector<2x128xf32>
    %152 = arith.addf %151, %150 : vector<2x128xf32>
    %153 = arith.divf %151, %152 : vector<2x128xf32>
    %154 = arith.select %14, %148, %153 : vector<2x128xi1>, vector<2x128xf32>
    %155 = vector.extract_strided_slice %154 {offsets = [0, 0], sizes = [2, 32], strides = [1, 1]} : vector<2x128xf32> to vector<2x32xf32>
    %156 = vector.extract_strided_slice %154 {offsets = [0, 32], sizes = [2, 32], strides = [1, 1]} : vector<2x128xf32> to vector<2x32xf32>
    %157 = vector.extract_strided_slice %154 {offsets = [0, 64], sizes = [2, 32], strides = [1, 1]} : vector<2x128xf32> to vector<2x32xf32>
    %158 = vector.extract_strided_slice %154 {offsets = [0, 96], sizes = [2, 32], strides = [1, 1]} : vector<2x128xf32> to vector<2x32xf32>
    %159 = arith.mulf %156, %140 : vector<2x32xf32>
    %160 = arith.mulf %155, %157 : vector<2x32xf32>
    %161 = arith.addf %159, %160 : vector<2x32xf32>
    %162 = math.tanh %161 : vector<2x32xf32>
    %163 = arith.mulf %158, %162 : vector<2x32xf32>
    %164 = vector.extract_strided_slice %8 {offsets = [0, 7, 0], sizes = [2, 1, 128], strides = [1, 1, 1]} : vector<2x8x128xf32> to vector<2x1x128xf32>
    %165 = vector.shape_cast %164 : vector<2x1x128xf32> to vector<2x128xf32>
    %166 = arith.truncf %163 : vector<2x32xf32> to vector<2x32xbf16>
    %cst_24 = arith.constant dense<0.000000e+00> : vector<2x128xf32>
    %167 = tpu.matmul %166, %1, %cst_24 {dimension_numbers = #tpu.dot_dimension_numbers<[1], [0], [0], [1], [0, 0, 1, 1], [], []>} : vector<2x32xbf16>, vector<32x128xbf16>, vector<2x128xf32> -> vector<2x128xf32>
    %168 = arith.addf %165, %167 : vector<2x128xf32>
    %169 = math.tanh %168 : vector<2x128xf32>
    %170 = arith.negf %168 : vector<2x128xf32>
    %171 = math.exp %170 : vector<2x128xf32>
    %cst_25 = arith.constant 1.000000e+00 : f32
    %172 = vector.broadcast %cst_25 : f32 to vector<2x128xf32>
    %173 = arith.addf %172, %171 : vector<2x128xf32>
    %174 = arith.divf %172, %173 : vector<2x128xf32>
    %175 = arith.select %14, %169, %174 : vector<2x128xi1>, vector<2x128xf32>
    %176 = vector.extract_strided_slice %175 {offsets = [0, 0], sizes = [2, 32], strides = [1, 1]} : vector<2x128xf32> to vector<2x32xf32>
    %177 = vector.extract_strided_slice %175 {offsets = [0, 32], sizes = [2, 32], strides = [1, 1]} : vector<2x128xf32> to vector<2x32xf32>
    %178 = vector.extract_strided_slice %175 {offsets = [0, 64], sizes = [2, 32], strides = [1, 1]} : vector<2x128xf32> to vector<2x32xf32>
    %179 = vector.extract_strided_slice %175 {offsets = [0, 96], sizes = [2, 32], strides = [1, 1]} : vector<2x128xf32> to vector<2x32xf32>
    %180 = arith.mulf %177, %161 : vector<2x32xf32>
    %181 = arith.mulf %176, %178 : vector<2x32xf32>
    %182 = arith.addf %180, %181 : vector<2x32xf32>
    %183 = math.tanh %182 : vector<2x32xf32>
    %184 = arith.mulf %179, %183 : vector<2x32xf32>
    %c0_26 = arith.constant 0 : index
    %c0_27 = arith.constant 0 : index
    %185 = vector.load %arg4[%c0_26, %c0_27] : memref<32x8xf32, #tpu.memory_space<vmem>>, vector<32x8xf32>
    %cst_28 = arith.constant dense<0.000000e+00> : vector<2x8xf32>
    %186 = tpu.matmul %184, %185, %cst_28 {dimension_numbers = #tpu.dot_dimension_numbers<[1], [0], [0], [1], [0, 0, 1, 1], [], []>} : vector<2x32xf32>, vector<32x8xf32>, vector<2x8xf32> -> vector<2x8xf32>
    %c0_29 = arith.constant 0 : index
    %c0_30 = arith.constant 0 : index
    %187 = vector.load %arg5[%c0_29, %c0_30] : memref<1x8xf32, #tpu.memory_space<vmem>>, vector<1x8xf32>
    %188 = vector.broadcast %187 : vector<1x8xf32> to vector<2x8xf32>
    %189 = arith.addf %186, %188 : vector<2x8xf32>
    %c0_31 = arith.constant 0 : index
    %c0_32 = arith.constant 0 : index
    %190 = vector.load %arg6[%c0_31, %c0_32] : memref<2x8xf32, #tpu.memory_space<vmem>>, vector<2x8xf32>
    tpu.vector_store %arg6[%c0_31, %c0_32], %189 {strides = array<i32>} : memref<2x8xf32, #tpu.memory_space<vmem>>, vector<2x8xf32>,
    return
  }
}

</mosaic_0001>

<bundles_post_ra>
// kernel: tpu_custom_call.1
= control target key start
LH: loop header
LB: loop body
LE: loop exit
PB: predicated region body
PF: predicated region fallthrough
CT: control target
= control target key end

     0   :  { %v1278_v1 = vmov 0.0   ;;  %vm1279_vm0 = vmmov 0   ;;  %vm51_vm1 = vcmask 130048   ;;  %s1509_s0 = inlined_call_operand.vmem [shape: bf16[2,8,16], index: 0, kind: input, shape index: {}]   ;;  %s1510_s1 = inlined_call_operand.vmem [shape: bf16[16,128], index: 1, kind: input, shape index: {}]   ;;  %s1511_s2 = inlined_call_operand.vmem [shape: bf16[32,128], index: 2, kind: input, shape index: {}]   ;;  %s1512_s3 = inlined_call_operand.vmem [shape: f32[1,128], index: 3, kind: input, shape index: {}]   ;;  %s1513_s4 = inlined_call_operand.vmem [shape: f32[32,8], index: 4, kind: input, shape index: {}]   ;;  %s1514_s5 = inlined_call_operand.vmem [shape: f32[1,8], index: 5, kind: input, shape index: {}]   ;;  %s1515_s6 = inlined_call_operand.hbm [shape: f32[2,8], index: 6, kind: output, shape index: {}]  }
   0x1   :  { %v1140_v0 = vld [vmem:[%s1510_s1] sm:$0xff]   ;;  %1053 = vmatprep.subr.bf16.mxu0 %v1278_v1  ;;  %1059 = vmatprep.subr.bf16.mxu1 %v1278_v1  ;;  %v1327_v2 = vld [vmem:[%s1511_s2 + $0x8] sm:$0xff]  }
   0x2   :  { %1054 = vmatpush3.bf16.msra.mxu0 %v1140_v0  ;;  %1055 = vmatprep.mubr.msk.bf16.mxu0 %vm1279_vm0, %v1278_v1  ;;  %v1142_v3 = vld [vmem:[%s1509_s0] sm:$0xff]  }
   0x3   :  { %1060 = vmatpush3.bf16.msra.mxu1 %v1327_v2  ;;  %v1338_v4 = vld [vmem:[%s1511_s2] sm:$0xff]   ;;  %1063 = vmatprep.mubr.msk.bf16.mxu1 %vm1279_vm0, %v1278_v1 }
   0x4   :  { %1061 = vmatprep.subr.bf16.mxu1 %v1278_v1  ;;  %1067 = vmatprep.subr.bf16.mxu0 %v1278_v1 }
   0x5   :  { %11 = vsyncpa [#allocation3], 0  ;;  %1056 = vmatmul.mubr.msk.bf16.vlgmr.msra.gmra.mxu0 %vm51_vm1, %v1142_v3  ;;  %v1280_v5 = vmov 0   ;;  %v991_v7 = vld [vmem:[%s1512_s3] ss:$0 sm:$0xff]  ;;  %v96_v26 = vlaneseq  ;;  %vm180_vm4 = vcmask 1041409  }
   0x6   :  { %1068 = vmatpush3.bf16.msra.mxu0 %v1327_v2  ;;  %1071 = vmatprep.mubr.msk.bf16.mxu0 %vm1279_vm0, %v1278_v1  ;;  %s1281_s3 = smov 64   ;;  %s1282_s28 = smov 32   ;;  %vm113_vm6 = vcmask 261120   ;;  %v890_v32 = vld [vmem:[%s1513_s4 + $0x8] sm:$0xff]  ;;  %vm975_vm7 = vcmask 58368  }
   0x7   :  { %1062 = vmatpush3.bf16.msra.mxu1 %v1338_v4  ;;  %1069 = vmatprep.subr.bf16.mxu0 %v1278_v1  ;;  %v97_v27 = vand.u32 127, %v96_v26  ;;  %s1283_s15 = smov [#allocation2]  }
   0x8   :  { %1075 = vmatprep.subr.bf16.mxu1 %v1278_v1 }
   0x9   :  { %vm98_vm2 = vcmp.ge.s32.totalorder %v97_v27, 64  ;;  %vm99_vm3 = vcmp.lt.s32.totalorder %v97_v27, 96 }
   0xa   :  { %1064 = vmatmul.mubr.bf16.vlgmr.msra.gmra.mxu1 %v1280_v5  ;;  %1070 = vmatpush3.bf16.msra.mxu0 %v1338_v4  ;;  %vm1367_vm5 = vmand %vm98_vm2, %vm99_vm3 }
   0xb   :  { %1076 = vmatpush3.bf16.msra.mxu1 %v1327_v2  ;;  %1079 = vmatprep.mubr.msk.bf16.mxu1 %vm1279_vm0, %v1278_v1 }
   0xc   :  { %1077 = vmatprep.subr.bf16.mxu1 %v1278_v1  ;;  %1083 = vmatprep.subr.bf16.mxu0 %v1278_v1 }
   0xf   :  { %1078 = vmatpush3.bf16.msra.mxu1 %v1338_v4 }
  0x10   :  { %1091 = vmatprep.subr.bf16.mxu1 %v1278_v1 }
  0xc5   :  { %v89_v6 = vpop.f32.mrf.mxu0 }
  0xc6   :  { %v1361_v9 = vadd.f32 %v991_v7, %v89_v6 }
  0xc7   :  { %v1057_v8 = vpop.f32.mrf.mxu0 }
  0xc9   :  { %v92_v10 = vpop.f32.mrf.mxu0 }
  0xca   :  { %v1363_v11 = vadd.f32 %v991_v7, %v92_v10  ;;  %v151_v12 = vpop.f32.mrf.mxu1 }
  0xcb   :  { %v158_v13 = vrot.slane %v151_v12, 1  ;;  %v161_v14 = vadd.f32 %v151_v12, %v1361_v9  ;;  %v1058_v15 = vpop.f32.mrf.mxu0 }
  0xcc   :  { %v1065_v16 = vpop.f32.mrf.mxu1 }
  0xcd   :  { %v162_v17 = vadd.f32 %v158_v13, %v1363_v11  ;;  %v997_v18 = vmul.f32 -1.442695, %v161_v14 }
  0xce   :  { %v154_v19 = vpop.f32.mrf.mxu1 }
  0xcf   :  { %v998_v20 = vmul.f32 -1.442695, %v162_v17  ;;  %1144 = vpow2.f32 %v997_v18 }
  0xd0   :  { %v1066_v21 = vpop.f32.mrf.mxu1 }
  0xd1   :  { %1146 = vpow2.f32 %v998_v20 }
  0xd2   :  { %1148 = vtanh.f32 %v162_v17 }
  0xdc   :  { %v1145_v22 = vpop.eup %1144 }
  0xdd   :  { %v171_v24 = vadd.f32 1.0, %v1145_v22 }
  0xde   :  { %v1147_v23 = vpop.eup %1146 }
  0xdf   :  { %v172_v25 = vadd.f32 1.0, %v1147_v23  ;;  %v1149_v28 = vpop.eup %1148 }
  0xe0   :  { %v179_v29 = vrot.slane %v1149_v28, 7 }
  0xe1   :  { %1150 = vrcp.f32 %v172_v25 }
  0xe2   :  { %1152 = vtanh.f32 %v161_v14 }
  0xe3   :  { %1154 = vrcp.f32 %v171_v24 }
  0xee   :  { %v1151_v30 = vpop.eup %1150 }
  0xef   :  { %v1153_v31 = vpop.eup %1152  ;;  %v185_v33 = vrot.slane %v1151_v30, 7 }
  0xf0   :  { %v1155_v34 = vpop.eup %1154  ;;  %v181_v35 = vsel %vm180_vm4, %v179_v29, %v1153_v31 }
  0xf1   :  { %v186_v36 = vsel %vm180_vm4, %v185_v33, %v1155_v34 }
  0xf2   :  { %v188_v37 = vsel %vm1367_vm5, %v181_v35, %v186_v36 }
  0xf3   :  { %191 = vrot.lane.b32.xlu0 %v188_v37, %s1281_s3  ;;  %v189_v40 = vmul.f32 0.0, %v188_v37 }
 0x165   :  { %v192_v38 = vpop.permute.xlu0 %191 }
 0x166   :  { %v194_v39 = vmul.f32 %v192_v38, %v188_v37 }
 0x168   :  { %196 = vrot.lane.b32.xlu0 %v194_v39, %s1282_s28 }
 0x1da   :  { %v197_v41 = vpop.permute.xlu0 %196 }
 0x1db   :  { %v199_v42 = vadd.f32 %v197_v41, %v189_v40 }
 0x1dd   :  { %1156 = vtanh.f32 %v199_v42 }
 0x1ea   :  { %v1157_v43 = vpop.eup %1156 }
 0x1eb   :  { %202 = vrot.lane.b32.xlu1 %v1157_v43, %s1281_s3 }
 0x25d   :  { %v203_v44 = vpop.permute.xlu1 %202 }
 0x25e   :  { %v205_v45 = vmul.f32 %v203_v44, %v188_v37 }
 0x260   :  { %v206_v46 = vpack.c.bf16 %v205_v45, %v205_v45 }
 0x262   :  { %208 = vrot.lane.b32.xlu1 %v206_v46, %s1282_s28 }
 0x2d4   :  { %v209_v47 = vpop.permute.xlu1 %208 }
 0x2d5   :  { %1072 = vmatmul.mubr.msk.bf16.vlgmr.msra.gmra.mxu0 %vm113_vm6, %v209_v47 }
 0x2d6   :  { %1084 = vmatpush3.bf16.msra.mxu0 %v1327_v2  ;;  %1087 = vmatprep.mubr.msk.bf16.mxu0 %vm1279_vm0, %v1278_v1 }
 0x2d7   :  { %1085 = vmatprep.subr.bf16.mxu0 %v1278_v1 }
 0x2da   :  { %1086 = vmatpush3.bf16.msra.mxu0 %v1338_v4 }
 0x2db   :  { %1099 = vmatprep.subr.bf16.mxu0 %v1278_v1 }
 0x395   :  { %v247_v48 = vpop.f32.mrf.mxu0 }
 0x396   :  { %v254_v49 = vrot.slane %v247_v48, 7  ;;  %v258_v50 = vadd.f32 %v247_v48, %v1363_v11 }
 0x397   :  { %v1073_v51 = vpop.f32.mrf.mxu0 }
 0x398   :  { %v257_v52 = vadd.f32 %v254_v49, %v1361_v9  ;;  %v1001_v53 = vmul.f32 -1.442695, %v258_v50 }
 0x399   :  { %v250_v54 = vpop.f32.mrf.mxu0 }
 0x39a   :  { %v1000_v55 = vmul.f32 -1.442695, %v257_v52  ;;  %1158 = vpow2.f32 %v1001_v53 }
 0x39b   :  { %v1074_v56 = vpop.f32.mrf.mxu0 }
 0x39c   :  { %1160 = vpow2.f32 %v1000_v55 }
 0x39d   :  { %1162 = vtanh.f32 %v257_v52 }
 0x3a7   :  { %v1159_v57 = vpop.eup %1158 }
 0x3a8   :  { %v268_v60 = vadd.f32 1.0, %v1159_v57 }
 0x3a9   :  { %v1161_v58 = vpop.eup %1160 }
 0x3aa   :  { %v267_v59 = vadd.f32 1.0, %v1161_v58  ;;  %v1163_v61 = vpop.eup %1162 }
 0x3ab   :  { %v275_v62 = vrot.slane %v1163_v61, 1 }
 0x3ac   :  { %1164 = vrcp.f32 %v267_v59 }
 0x3ad   :  { %1166 = vtanh.f32 %v258_v50 }
 0x3ae   :  { %1168 = vrcp.f32 %v268_v60 }
 0x3b9   :  { %v1165_v63 = vpop.eup %1164 }
 0x3ba   :  { %v1167_v0 = vpop.eup %1166  ;;  %v280_v3 = vrot.slane %v1165_v63, 1 }
 0x3bb   :  { %v1169_v5 = vpop.eup %1168  ;;  %v276_v6 = vsel %vm180_vm4, %v1167_v0, %v275_v62 }
 0x3bc   :  { %v281_v7 = vsel %vm180_vm4, %v1169_v5, %v280_v3 }
 0x3bd   :  { %v283_v8 = vsel %vm1367_vm5, %v276_v6, %v281_v7 }
 0x3be   :  { %286 = vrot.lane.b32.xlu0 %v283_v8, %s1281_s3  ;;  %v284_v13 = vmul.f32 %v283_v8, %v199_v42 }
 0x430   :  { %v287_v10 = vpop.permute.xlu0 %286 }
 0x431   :  { %v289_v12 = vmul.f32 %v287_v10, %v283_v8 }
 0x433   :  { %291 = vrot.lane.b32.xlu1 %v289_v12, %s1282_s28 }
 0x4a5   :  { %v292_v14 = vpop.permute.xlu1 %291 }
 0x4a6   :  { %v294_v15 = vadd.f32 %v292_v14, %v284_v13 }
 0x4a8   :  { %1170 = vtanh.f32 %v294_v15 }
 0x4b5   :  { %v1171_v16 = vpop.eup %1170 }
 0x4b6   :  { %297 = vrot.lane.b32.xlu0 %v1171_v16, %s1281_s3 }
 0x528   :  { %v298_v17 = vpop.permute.xlu0 %297 }
 0x529   :  { %v300_v18 = vmul.f32 %v298_v17, %v283_v8 }
 0x52b   :  { %v301_v19 = vpack.c.bf16 %v300_v18, %v300_v18 }
 0x52d   :  { %303 = vrot.lane.b32.xlu1 %v301_v19, %s1282_s28 }
 0x59f   :  { %v304_v20 = vpop.permute.xlu1 %303 }
 0x5a0   :  { %1080 = vmatmul.mubr.msk.bf16.vlgmr.msra.gmra.mxu1 %vm113_vm6, %v304_v20 }
 0x5a1   :  { %1092 = vmatpush3.bf16.msra.mxu1 %v1327_v2  ;;  %1095 = vmatprep.mubr.msk.bf16.mxu1 %vm1279_vm0, %v1278_v1 }
 0x5a2   :  { %1093 = vmatprep.subr.bf16.mxu1 %v1278_v1 }
 0x5a5   :  { %1094 = vmatpush3.bf16.msra.mxu1 %v1338_v4 }
 0x5a6   :  { %1107 = vmatprep.subr.bf16.mxu1 %v1278_v1 }
 0x660   :  { %v342_v21 = vpop.f32.mrf.mxu1 }
 0x661   :  { %v349_v22 = vrot.slane %v342_v21, 6  ;;  %v350_v23 = vrot.slane %v342_v21, 7 }
 0x662   :  { %v1081_v24 = vpop.f32.mrf.mxu1 }
 0x663   :  { %v353_v25 = vadd.f32 %v349_v22, %v1361_v9  ;;  %v354_v26 = vadd.f32 %v350_v23, %v1363_v11 }
 0x664   :  { %v345_v27 = vpop.f32.mrf.mxu1 }
 0x665   :  { %v1003_v28 = vmul.f32 -1.442695, %v353_v25  ;;  %v1004_v29 = vmul.f32 -1.442695, %v354_v26 }
 0x666   :  { %v1082_v30 = vpop.f32.mrf.mxu1 }
 0x667   :  { %1172 = vpow2.f32 %v1003_v28 }
 0x668   :  { %1174 = vpow2.f32 %v1004_v29 }
 0x669   :  { %1176 = vtanh.f32 %v353_v25 }
 0x66a   :  { %1178 = vtanh.f32 %v354_v26 }
 0x674   :  { %v1173_v31 = vpop.eup %1172 }
 0x675   :  { %v1175_v33 = vpop.eup %1174  ;;  %v363_v34 = vadd.f32 1.0, %v1173_v31 }
 0x676   :  { %v364_v35 = vadd.f32 1.0, %v1175_v33  ;;  %v1177_v36 = vpop.eup %1176 }
 0x677   :  { %1180 = vrcp.f32 %v363_v34  ;;  %v1179_v37 = vpop.eup %1178  ;;  %v371_v39 = vrot.slane %v1177_v36, 2 }
 0x678   :  { %1182 = vrcp.f32 %v364_v35  ;;  %v372_v40 = vrot.slane %v1179_v37, 1 }
 0x67a   :  { %v373_v44 = vsel %vm180_vm4, %v372_v40, %v371_v39 }
 0x684   :  { %v1181_v38 = vpop.eup %1180 }
 0x685   :  { %v1183_v41 = vpop.eup %1182  ;;  %v377_v42 = vrot.slane %v1181_v38, 2 }
 0x686   :  { %v378_v43 = vrot.slane %v1183_v41, 1 }
 0x688   :  { %v379_v45 = vsel %vm180_vm4, %v378_v43, %v377_v42 }
 0x689   :  { %v381_v46 = vsel %vm1367_vm5, %v373_v44, %v379_v45 }
 0x68a   :  { %384 = vrot.lane.b32.xlu0 %v381_v46, %s1281_s3  ;;  %v382_v49 = vmul.f32 %v381_v46, %v294_v15 }
 0x6fc   :  { %v385_v47 = vpop.permute.xlu0 %384 }
 0x6fd   :  { %v387_v48 = vmul.f32 %v385_v47, %v381_v46 }
 0x6ff   :  { %389 = vrot.lane.b32.xlu1 %v387_v48, %s1282_s28 }
 0x771   :  { %v390_v50 = vpop.permute.xlu1 %389 }
 0x772   :  { %v392_v51 = vadd.f32 %v390_v50, %v382_v49 }
 0x774   :  { %1184 = vtanh.f32 %v392_v51 }
 0x781   :  { %v1185_v52 = vpop.eup %1184 }
 0x782   :  { %395 = vrot.lane.b32.xlu0 %v1185_v52, %s1281_s3 }
 0x7f4   :  { %v396_v53 = vpop.permute.xlu0 %395 }
 0x7f5   :  { %v398_v54 = vmul.f32 %v396_v53, %v381_v46 }
 0x7f7   :  { %v399_v55 = vpack.c.bf16 %v398_v54, %v398_v54 }
 0x7f9   :  { %401 = vrot.lane.b32.xlu1 %v399_v55, %s1282_s28 }
 0x86b   :  { %v402_v56 = vpop.permute.xlu1 %401 }
 0x86c   :  { %1088 = vmatmul.mubr.msk.bf16.vlgmr.msra.gmra.mxu0 %vm113_vm6, %v402_v56 }
 0x86d   :  { %1100 = vmatpush3.bf16.msra.mxu0 %v1327_v2  ;;  %1103 = vmatprep.mubr.msk.bf16.mxu0 %vm1279_vm0, %v1278_v1 }
 0x86e   :  { %1101 = vmatprep.subr.bf16.mxu0 %v1278_v1 }
 0x871   :  { %1102 = vmatpush3.bf16.msra.mxu0 %v1338_v4 }
 0x872   :  { %1115 = vmatprep.subr.bf16.mxu0 %v1278_v1 }
 0x92c   :  { %v440_v57 = vpop.f32.mrf.mxu0 }
 0x92d   :  { %v447_v58 = vrot.slane %v440_v57, 5  ;;  %v448_v59 = vrot.slane %v440_v57, 6 }
 0x92e   :  { %v1089_v60 = vpop.f32.mrf.mxu0 }
 0x92f   :  { %v451_v61 = vadd.f32 %v447_v58, %v1361_v9  ;;  %v452_v62 = vadd.f32 %v448_v59, %v1363_v11 }
 0x930   :  { %v443_v63 = vpop.f32.mrf.mxu0 }
 0x931   :  { %v1006_v0 = vmul.f32 -1.442695, %v451_v61  ;;  %v1007_v3 = vmul.f32 -1.442695, %v452_v62 }
 0x932   :  { %v1090_v5 = vpop.f32.mrf.mxu0 }
 0x933   :  { %1186 = vpow2.f32 %v1006_v0 }
 0x934   :  { %1188 = vpow2.f32 %v1007_v3 }
 0x935   :  { %1190 = vtanh.f32 %v451_v61 }
 0x936   :  { %1192 = vtanh.f32 %v452_v62 }
 0x940   :  { %v1187_v6 = vpop.eup %1186 }
 0x941   :  { %v1189_v7 = vpop.eup %1188  ;;  %v461_v8 = vadd.f32 1.0, %v1187_v6 }
 0x942   :  { %v462_v10 = vadd.f32 1.0, %v1189_v7  ;;  %v1191_v12 = vpop.eup %1190 }
 0x943   :  { %1194 = vrcp.f32 %v461_v8  ;;  %v1193_v13 = vpop.eup %1192  ;;  %v469_v15 = vrot.slane %v1191_v12, 3 }
 0x944   :  { %1196 = vrcp.f32 %v462_v10  ;;  %v470_v16 = vrot.slane %v1193_v13, 2 }
 0x946   :  { %v471_v20 = vsel %vm180_vm4, %v470_v16, %v469_v15 }
 0x950   :  { %v1195_v14 = vpop.eup %1194 }
 0x951   :  { %v1197_v17 = vpop.eup %1196  ;;  %v475_v18 = vrot.slane %v1195_v14, 3 }
 0x952   :  { %v476_v19 = vrot.slane %v1197_v17, 2 }
 0x954   :  { %v477_v21 = vsel %vm180_vm4, %v476_v19, %v475_v18 }
 0x955   :  { %v479_v22 = vsel %vm1367_vm5, %v471_v20, %v477_v21 }
 0x956   :  { %482 = vrot.lane.b32.xlu0 %v479_v22, %s1281_s3  ;;  %v480_v25 = vmul.f32 %v479_v22, %v392_v51 }
 0x9c8   :  { %v483_v23 = vpop.permute.xlu0 %482 }
 0x9c9   :  { %v485_v24 = vmul.f32 %v483_v23, %v479_v22 }
 0x9cb   :  { %487 = vrot.lane.b32.xlu1 %v485_v24, %s1282_s28 }
 0xa3d   :  { %v488_v26 = vpop.permute.xlu1 %487 }
 0xa3e   :  { %v490_v27 = vadd.f32 %v488_v26, %v480_v25 }
 0xa40   :  { %1198 = vtanh.f32 %v490_v27 }
 0xa4d   :  { %v1199_v28 = vpop.eup %1198 }
 0xa4e   :  { %493 = vrot.lane.b32.xlu0 %v1199_v28, %s1281_s3 }
 0xac0   :  { %v494_v29 = vpop.permute.xlu0 %493 }
 0xac1   :  { %v496_v30 = vmul.f32 %v494_v29, %v479_v22 }
 0xac3   :  { %v497_v31 = vpack.c.bf16 %v496_v30, %v496_v30 }
 0xac5   :  { %499 = vrot.lane.b32.xlu1 %v497_v31, %s1282_s28 }
 0xb37   :  { %v500_v33 = vpop.permute.xlu1 %499 }
 0xb38   :  { %1096 = vmatmul.mubr.msk.bf16.vlgmr.msra.gmra.mxu1 %vm113_vm6, %v500_v33 }
 0xb39   :  { %1108 = vmatpush3.bf16.msra.mxu1 %v1327_v2  ;;  %1111 = vmatprep.mubr.msk.bf16.mxu1 %vm1279_vm0, %v1278_v1 }
 0xb3a   :  { %1109 = vmatprep.subr.bf16.mxu1 %v1278_v1 }
 0xb3d   :  { %1110 = vmatpush3.bf16.msra.mxu1 %v1338_v4 }
 0xb3e   :  { %1123 = vmatprep.subr.mxu1 %v1278_v1 }
 0xbf8   :  { %v538_v34 = vpop.f32.mrf.mxu1 }
 0xbf9   :  { %v545_v35 = vrot.slane %v538_v34, 4  ;;  %v546_v36 = vrot.slane %v538_v34, 5 }
 0xbfa   :  { %v1097_v37 = vpop.f32.mrf.mxu1 }
 0xbfb   :  { %v549_v38 = vadd.f32 %v545_v35, %v1361_v9  ;;  %v550_v39 = vadd.f32 %v546_v36, %v1363_v11 }
 0xbfc   :  { %v541_v40 = vpop.f32.mrf.mxu1 }
 0xbfd   :  { %v1009_v41 = vmul.f32 -1.442695, %v549_v38  ;;  %v1010_v42 = vmul.f32 -1.442695, %v550_v39 }
 0xbfe   :  { %v1098_v43 = vpop.f32.mrf.mxu1 }
 0xbff   :  { %1200 = vpow2.f32 %v1009_v41 }
 0xc00   :  { %1202 = vpow2.f32 %v1010_v42 }
 0xc01   :  { %1204 = vtanh.f32 %v549_v38 }
 0xc02   :  { %1206 = vtanh.f32 %v550_v39 }
 0xc0c   :  { %v1201_v44 = vpop.eup %1200 }
 0xc0d   :  { %v1203_v45 = vpop.eup %1202  ;;  %v559_v46 = vadd.f32 1.0, %v1201_v44 }
 0xc0e   :  { %v560_v47 = vadd.f32 1.0, %v1203_v45  ;;  %v1205_v48 = vpop.eup %1204 }
 0xc0f   :  { %1208 = vrcp.f32 %v559_v46  ;;  %v1207_v49 = vpop.eup %1206  ;;  %v567_v51 = vrot.slane %v1205_v48, 4 }
 0xc10   :  { %1210 = vrcp.f32 %v560_v47  ;;  %v568_v52 = vrot.slane %v1207_v49, 3 }
 0xc12   :  { %v569_v56 = vsel %vm180_vm4, %v568_v52, %v567_v51 }
 0xc1c   :  { %v1209_v50 = vpop.eup %1208 }
 0xc1d   :  { %v1211_v53 = vpop.eup %1210  ;;  %v573_v54 = vrot.slane %v1209_v50, 4 }
 0xc1e   :  { %v574_v55 = vrot.slane %v1211_v53, 3 }
 0xc20   :  { %v575_v57 = vsel %vm180_vm4, %v574_v55, %v573_v54 }
 0xc21   :  { %v577_v58 = vsel %vm1367_vm5, %v569_v56, %v575_v57 }
 0xc22   :  { %580 = vrot.lane.b32.xlu0 %v577_v58, %s1281_s3  ;;  %v578_v61 = vmul.f32 %v577_v58, %v490_v27 }
 0xc94   :  { %v581_v59 = vpop.permute.xlu0 %580 }
 0xc95   :  { %v583_v60 = vmul.f32 %v581_v59, %v577_v58 }
 0xc97   :  { %585 = vrot.lane.b32.xlu1 %v583_v60, %s1282_s28 }
 0xd09   :  { %v586_v62 = vpop.permute.xlu1 %585 }
 0xd0a   :  { %v588_v63 = vadd.f32 %v586_v62, %v578_v61 }
 0xd0c   :  { %1212 = vtanh.f32 %v588_v63 }
 0xd19   :  { %v1213_v0 = vpop.eup %1212 }
 0xd1a   :  { %591 = vrot.lane.b32.xlu0 %v1213_v0, %s1281_s3 }
 0xd8c   :  { %v592_v3 = vpop.permute.xlu0 %591 }
 0xd8d   :  { %v594_v5 = vmul.f32 %v592_v3, %v577_v58 }
 0xd8f   :  { %v595_v6 = vpack.c.bf16 %v594_v5, %v594_v5 }
 0xd91   :  { %597 = vrot.lane.b32.xlu1 %v595_v6, %s1282_s28 }
 0xe03   :  { %v598_v7 = vpop.permute.xlu1 %597 }
 0xe04   :  { %1104 = vmatmul.mubr.msk.bf16.vlgmr.msra.gmra.mxu0 %vm113_vm6, %v598_v7 }
 0xe05   :  { %1116 = vmatpush3.bf16.msra.mxu0 %v1327_v2  ;;  %1119 = vmatprep.mubr.msk.bf16.mxu0 %vm1279_vm0, %v1278_v1 }
 0xe06   :  { %1117 = vmatprep.subr.bf16.mxu0 %v1278_v1 }
 0xe09   :  { %1118 = vmatpush3.bf16.msra.mxu0 %v1338_v4 }
 0xec4   :  { %v636_v8 = vpop.f32.mrf.mxu0 }
 0xec5   :  { %v643_v10 = vrot.slane %v636_v8, 3  ;;  %v644_v12 = vrot.slane %v636_v8, 4 }
 0xec6   :  { %v1105_v13 = vpop.f32.mrf.mxu0 }
 0xec7   :  { %v647_v14 = vadd.f32 %v643_v10, %v1361_v9  ;;  %v648_v15 = vadd.f32 %v644_v12, %v1363_v11 }
 0xec8   :  { %v639_v16 = vpop.f32.mrf.mxu0 }
 0xec9   :  { %v1012_v17 = vmul.f32 -1.442695, %v647_v14  ;;  %v1013_v18 = vmul.f32 -1.442695, %v648_v15 }
 0xeca   :  { %v1106_v19 = vpop.f32.mrf.mxu0 }
 0xecb   :  { %1214 = vpow2.f32 %v1012_v17 }
 0xecc   :  { %1216 = vpow2.f32 %v1013_v18 }
 0xecd   :  { %1218 = vtanh.f32 %v647_v14 }
 0xece   :  { %1220 = vtanh.f32 %v648_v15 }
 0xed8   :  { %v1215_v2 = vpop.eup %1214 }
 0xed9   :  { %v1217_v20 = vpop.eup %1216  ;;  %v657_v21 = vadd.f32 1.0, %v1215_v2 }
 0xeda   :  { %v658_v4 = vadd.f32 1.0, %v1217_v20  ;;  %v1219_v22 = vpop.eup %1218 }
 0xedb   :  { %1222 = vrcp.f32 %v657_v21  ;;  %v1221_v23 = vpop.eup %1220  ;;  %v665_v25 = vrot.slane %v1219_v22, 5 }
 0xedc   :  { %1224 = vrcp.f32 %v658_v4  ;;  %v666_v26 = vrot.slane %v1221_v23, 4 }
 0xede   :  { %v667_v30 = vsel %vm180_vm4, %v666_v26, %v665_v25 }
 0xee8   :  { %v1223_v24 = vpop.eup %1222 }
 0xee9   :  { %v1225_v27 = vpop.eup %1224  ;;  %v671_v28 = vrot.slane %v1223_v24, 5 }
 0xeea   :  { %v672_v29 = vrot.slane %v1225_v27, 4 }
 0xeec   :  { %v673_v31 = vsel %vm180_vm4, %v672_v29, %v671_v28 }
 0xeed   :  { %v675_v33 = vsel %vm1367_vm5, %v667_v30, %v673_v31 }
 0xeee   :  { %678 = vrot.lane.b32.xlu0 %v675_v33, %s1281_s3  ;;  %v676_v36 = vmul.f32 %v675_v33, %v588_v63 }
 0xf60   :  { %v679_v34 = vpop.permute.xlu0 %678 }
 0xf61   :  { %v681_v35 = vmul.f32 %v679_v34, %v675_v33 }
 0xf63   :  { %683 = vrot.lane.b32.xlu1 %v681_v35, %s1282_s28 }
 0xfd5   :  { %v684_v37 = vpop.permute.xlu1 %683 }
 0xfd6   :  { %v686_v38 = vadd.f32 %v684_v37, %v676_v36 }
 0xfd8   :  { %1226 = vtanh.f32 %v686_v38 }
 0xfe5   :  { %v1227_v39 = vpop.eup %1226 }
 0xfe6   :  { %689 = vrot.lane.b32.xlu0 %v1227_v39, %s1281_s3 }
0x1058   :  { %v690_v40 = vpop.permute.xlu0 %689 }
0x1059   :  { %v692_v41 = vmul.f32 %v690_v40, %v675_v33 }
0x105b   :  { %v693_v42 = vpack.c.bf16 %v692_v41, %v692_v41 }
0x105d   :  { %695 = vrot.lane.b32.xlu1 %v693_v42, %s1282_s28 }
0x10cf   :  { %v696_v43 = vpop.permute.xlu1 %695 }
0x10d0   :  { %1112 = vmatmul.mubr.msk.bf16.vlgmr.msra.gmra.mxu1 %vm113_vm6, %v696_v43 }
0x10d1   :  { %1131 = vmatprep.mubr.msk.f32.mxu1 %vm1279_vm0, %v1278_v1 }
0x1190   :  { %v734_v44 = vpop.f32.mrf.mxu1 }
0x1191   :  { %v741_v45 = vrot.slane %v734_v44, 2  ;;  %v742_v46 = vrot.slane %v734_v44, 3 }
0x1192   :  { %v1113_v47 = vpop.f32.mrf.mxu1 }
0x1193   :  { %v745_v48 = vadd.f32 %v741_v45, %v1361_v9  ;;  %v746_v49 = vadd.f32 %v742_v46, %v1363_v11  ;;  %v892_v47 = vld [vmem:[%s1513_s4 + $0x18] sm:$0xff] }
0x1194   :  { %v737_v50 = vpop.f32.mrf.mxu1  ;;  %1124 = vmatpush3.msra.mxu1 %v892_v47 }
0x1195   :  { %v1015_v51 = vmul.f32 -1.442695, %v745_v48  ;;  %v1016_v52 = vmul.f32 -1.442695, %v746_v49  ;;  %1125 = vmatprep.subr.mxu1 %v1278_v1 }
0x1196   :  { %v1114_v53 = vpop.f32.mrf.mxu1 }
0x1197   :  { %1228 = vpow2.f32 %v1015_v51 }
0x1198   :  { %1230 = vpow2.f32 %v1016_v52 }
0x1199   :  { %1232 = vtanh.f32 %v745_v48  ;;  %v891_v48 = vld [vmem:[%s1513_s4 + $0x10] sm:$0xff] }
0x119a   :  { %1234 = vtanh.f32 %v746_v49  ;;  %1126 = vmatpush3.msra.mxu1 %v891_v48  ;;  %v889_v49 = vld [vmem:[%s1513_s4] sm:$0xff]  ;;  %s983_s4 = sshll.u32 %s1283_s15, 4  ;;  %s984_s4 = int_to_ptr.vmem [resolvable:$true] %s983_s4 }
0x119b   :  { %1127 = vmatprep.subr.mxu1 %v1278_v1  ;;  %s1256_s16 = scalar_lea.vmem %s984_s4, 32  ;;  %p1261_p1 = scmp.lt.s32.totalorder %s984_s4, %s984_s4 }
0x119c   :  { %1128 = vmatpush3.msra.mxu1 %v890_v32  ;;  %p1257_p0 = scmp.ne.s32.totalorder %s984_s4, %s1256_s16  ;;  %p1262_p2 = scmp.lt.s32.totalorder %s1256_s16, %s1256_s16 }
0x119d   :  { %1129 = vmatprep.subr.mxu1 %v1278_v1 }
0x119e   :  { %1130 = vmatpush3.msra.mxu1 %v889_v49  ;;  %p1263_p3 = por %p1262_p2, %p1261_p1 }
0x11a0   :  { %p1264_p4 = pnand %p1263_p3, %p1257_p0 }
0x11a4   :  { %v1229_v54 = vpop.eup %1228 }
0x11a5   :  { %v1231_v55 = vpop.eup %1230  ;;  %v755_v56 = vadd.f32 1.0, %v1229_v54  ;;  %v1020_v54 = vld [vmem:[%s1514_s5] ss:$0 sm:$0xff] }
0x11a6   :  { %v756_v57 = vadd.f32 1.0, %v1231_v55  ;;  %v1233_v58 = vpop.eup %1232 }
0x11a7   :  { %1236 = vrcp.f32 %v755_v56  ;;  %v1235_v59 = vpop.eup %1234  ;;  %v763_v61 = vrot.slane %v1233_v58, 6 }
0x11a8   :  { %1238 = vrcp.f32 %v756_v57  ;;  %v764_v62 = vrot.slane %v1235_v59, 5 }
0x11aa   :  { %v765_v5 = vsel %vm180_vm4, %v764_v62, %v763_v61 }
0x11b4   :  { %v1237_v60 = vpop.eup %1236 }
0x11b5   :  { %v1239_v63 = vpop.eup %1238  ;;  %v769_v0 = vrot.slane %v1237_v60, 6 }
0x11b6   :  { %v770_v3 = vrot.slane %v1239_v63, 5 }
0x11b8   :  { %v771_v6 = vsel %vm180_vm4, %v770_v3, %v769_v0 }
0x11b9   :  { %v773_v7 = vsel %vm1367_vm5, %v765_v5, %v771_v6 }
0x11ba   :  { %776 = vrot.lane.b32.xlu0 %v773_v7, %s1281_s3  ;;  %v774_v12 = vmul.f32 %v773_v7, %v686_v38 }
0x122c   :  { %v777_v8 = vpop.permute.xlu0 %776 }
0x122d   :  { %v779_v10 = vmul.f32 %v777_v8, %v773_v7 }
0x122f   :  { %781 = vrot.lane.b32.xlu1 %v779_v10, %s1282_s28 }
0x12a1   :  { %v782_v13 = vpop.permute.xlu1 %781 }
0x12a2   :  { %v784_v14 = vadd.f32 %v782_v13, %v774_v12 }
0x12a4   :  { %1240 = vtanh.f32 %v784_v14 }
0x12b1   :  { %v1241_v15 = vpop.eup %1240 }
0x12b2   :  { %787 = vrot.lane.b32.xlu0 %v1241_v15, %s1281_s3 }
0x1324   :  { %v788_v16 = vpop.permute.xlu0 %787 }
0x1325   :  { %v790_v17 = vmul.f32 %v788_v16, %v773_v7 }
0x1327   :  { %v791_v18 = vpack.c.bf16 %v790_v17, %v790_v17 }
0x1329   :  { %793 = vrot.lane.b32.xlu1 %v791_v18, %s1282_s28 }
0x139b   :  { %v794_v19 = vpop.permute.xlu1 %793 }
0x139c   :  { %1120 = vmatmul.mubr.msk.bf16.vlgmr.msra.gmra.mxu0 %vm113_vm6, %v794_v19 }
0x145c   :  { %v832_v2 = vpop.f32.mrf.mxu0 }
0x145d   :  { %v839_v20 = vrot.slane %v832_v2, 1  ;;  %v840_v21 = vrot.slane %v832_v2, 2 }
0x145e   :  { %v1121_v4 = vpop.f32.mrf.mxu0 }
0x145f   :  { %v843_v22 = vadd.f32 %v839_v20, %v1361_v9  ;;  %v844_v23 = vadd.f32 %v840_v21, %v1363_v11 }
0x1460   :  { %v835_v24 = vpop.f32.mrf.mxu0 }
0x1461   :  { %v1018_v25 = vmul.f32 -1.442695, %v843_v22  ;;  %v1019_v26 = vmul.f32 -1.442695, %v844_v23 }
0x1462   :  { %v1122_v27 = vpop.f32.mrf.mxu0 }
0x1463   :  { %1242 = vpow2.f32 %v1018_v25 }
0x1464   :  { %1244 = vpow2.f32 %v1019_v26 }
0x1465   :  { %1246 = vtanh.f32 %v843_v22 }
0x1466   :  { %1248 = vtanh.f32 %v844_v23 }
0x1470   :  { %v1243_v28 = vpop.eup %1242 }
0x1471   :  { %v1245_v29 = vpop.eup %1244  ;;  %v853_v30 = vadd.f32 1.0, %v1243_v28 }
0x1472   :  { %v854_v31 = vadd.f32 1.0, %v1245_v29  ;;  %v1247_v33 = vpop.eup %1246 }
0x1473   :  { %1250 = vrcp.f32 %v853_v30  ;;  %v1249_v34 = vpop.eup %1248  ;;  %v861_v9 = vrot.slane %v1247_v33, 7 }
0x1474   :  { %1252 = vrcp.f32 %v854_v31  ;;  %v862_v36 = vrot.slane %v1249_v34, 6 }
0x1476   :  { %v863_v39 = vsel %vm180_vm4, %v862_v36, %v861_v9 }
0x1480   :  { %v1251_v35 = vpop.eup %1250 }
0x1481   :  { %v1253_v11 = vpop.eup %1252  ;;  %v867_v37 = vrot.slane %v1251_v35, 7 }
0x1482   :  { %v868_v38 = vrot.slane %v1253_v11, 6 }
0x1484   :  { %v869_v40 = vsel %vm180_vm4, %v868_v38, %v867_v37 }
0x1485   :  { %v871_v41 = vsel %vm1367_vm5, %v863_v39, %v869_v40 }
0x1486   :  { %874 = vrot.lane.b32.xlu0 %v871_v41, %s1281_s3  ;;  %v872_v44 = vmul.f32 %v871_v41, %v784_v14 }
0x14f8   :  { %v875_v42 = vpop.permute.xlu0 %874 }
0x14f9   :  { %v877_v43 = vmul.f32 %v875_v42, %v871_v41 }
0x14fb   :  { %879 = vrot.lane.b32.xlu1 %v877_v43, %s1282_s28 }
0x156d   :  { %v880_v45 = vpop.permute.xlu1 %879 }
0x156e   :  { %v882_v46 = vadd.f32 %v880_v45, %v872_v44 }
0x1570   :  { %1254 = vtanh.f32 %v882_v46 }
0x157d   :  { %v1255_v50 = vpop.eup %1254 }
0x157e   :  { %885 = vrot.lane.b32.xlu0 %v1255_v50, %s1281_s3 }
0x15f0   :  { %v886_v51 = vpop.permute.xlu0 %885 }
0x15f1   :  { %v888_v52 = vmul.f32 %v886_v51, %v871_v41 }
0x15f3   :  { %901 = vrot.lane.b32.xlu1 %v888_v52, %s1282_s28 }
0x1665   :  { %v902_v53 = vpop.permute.xlu1 %901 }
0x1666   :  { %1132 = vmatmul.mubr.msk.f32.vlgmr.msra.gmra.mxu1 %vm113_vm6, %v902_v53 }
0x1726   :  { %v971_v55 = vpop.f32.mrf.mxu1 }
0x1727   :  { %v972_v1 = vadd.f32 %v1020_v54, %v971_v55 }
0x1728   :  { %v1133_v56 = vpop.f32.mrf.mxu1 }
0x1729   :  { %976 = vst.msk [vmem:[#allocation2] sm:$0x3] %vm975_vm7, %v972_v1 }
0x172a   :  { %1267 = shalt.err (!%p1264_p4)
}
0x172b   :  { %986 = dma.vmem_to_hbm [thread:$0]  %s984_s4, 32, %s1515_s6, [#allocation3]  }
0x172c   :  { %1276 = dma.done.wait [#allocation3], 32  }
0x172d   :  { %1277 = vsyncadd [#allocation3], 4294967264 }
0x172e   :  { %990 = vsyncpa [#allocation3], 1 }

</bundles_post_ra>
